<compile_context>
chip_gen: v6e
topology: v6e:2x2x1
jax: 0.10.0
libtpu: 0.0.40
codegen_flags: <defaults>
</compile_context>

<pallas_src>
import functools

import numpy as np
import jax
import jax.numpy as jnp
from jax.experimental import pallas as pl
from jax.experimental.pallas import tpu as pltpu


# ----------------------------------------------------------------------------
# pltpu.roll direction probe (run once, eagerly) so the depthwise-conv taps do
# not depend on the lane-rotation convention of the installed jax version.
# ----------------------------------------------------------------------------

def _roll_probe_kernel(x_ref, o_ref):
    o_ref[...] = pltpu.roll(x_ref[...], shift=1, axis=1)


def _roll_matches_jnp_roll():
    """True if pltpu.roll(x, s) == jnp.roll(x, s) (elements move to higher idx)."""
    row = jnp.arange(128, dtype=jnp.float32)[None, :]
    x = jnp.broadcast_to(row, (8, 128))
    y = pl.pallas_call(
        _roll_probe_kernel,
        out_shape=jax.ShapeDtypeStruct((8, 128), jnp.float32),
    )(x)
    return bool(y[0, 0] == 127.0)


# ----------------------------------------------------------------------------
# Fused forward kernel: one grid step == one image of the batch.
# ----------------------------------------------------------------------------

def _fused_attention_kernel(x_ref, weff_ref, ebias_ref, dw_ref, db_ref,
                            pw_ref, pb_ref, temp_ref, hbias_ref, mask_ref,
                            o_ref, *, W, roll_like_jnp):
    f32 = jnp.float32
    bf16 = jnp.bfloat16
    dim = o_ref.shape[1]
    HW = o_ref.shape[2]

    x = x_ref[0]                                       # (dim, HW) bf16

    # ---- folded (mix_conv + residual + qkv) 1x1 conv: one bf16 MXU pass ----
    qkv_x = (jnp.dot(weff_ref[...], x, preferred_element_type=f32)
             + ebias_ref[...])                         # (3*dim, HW) f32

    # ---- 3x3 depthwise conv (stride 1, pad 1) on the flat (C, H*W) layout --
    # 9 taps: XLU lane rolls + precomputed boundary masks + VPU MACs.
    dww = dw_ref[...]                                  # (3*dim, 9)
    acc = jnp.zeros_like(qkv_x)
    for di in (-1, 0, 1):
        for dj in (-1, 0, 1):
            s = di * W + dj                            # tap offset in flat pixels
            k_idx = (di + 1) * 3 + (dj + 1)
            if s == 0:
                tap = qkv_x                            # center tap: no mask needed
            else:
                amt = (-s) % HW if roll_like_jnp else s % HW
                tap = (pltpu.roll(qkv_x, shift=amt, axis=1)
                       * mask_ref[k_idx:k_idx + 1, :])
            acc = acc + dww[:, k_idx:k_idx + 1] * tap
    qkv = acc + db_ref[...]                            # (3*dim, HW) f32

    # ---- split q, k, v (head-major channel layout, 8-row aligned slices) ----
    q = qkv[0:dim]
    k = qkv[dim:2 * dim]
    v = qkv[2 * dim:3 * dim]

    # ---- F.normalize(dim=-1) via EUP rsqrt (eps^2 matches torch's 1e-12) ----
    qn = q * jax.lax.rsqrt(jnp.sum(q * q, axis=-1, keepdims=True) + 1e-24)
    kn = k * jax.lax.rsqrt(jnp.sum(k * k, axis=-1, keepdims=True) + 1e-24)

    # ---- all-heads channel attention (block-diagonal == per-head) ----------
    scores = jax.lax.dot_general(qn.astype(bf16), kn.astype(bf16),
                                 (((1,), (1,)), ((), ())),
                                 preferred_element_type=f32)     # (dim, dim)
    scores = scores * temp_ref[...] + hbias_ref[...]   # per-head temp + head mask
    scores = scores - jnp.max(scores, axis=-1, keepdims=True)
    e = jnp.exp(scores)
    p = e / jnp.sum(e, axis=-1, keepdims=True)         # exact softmax

    out = jnp.dot(p.astype(bf16), v.astype(bf16),
                  preferred_element_type=f32)          # (dim, HW)

    # ---- project_out 1x1 conv ----------------------------------------------
    res = (jnp.dot(pw_ref[...], out.astype(bf16), preferred_element_type=f32)
           + pb_ref[...])
    o_ref[0] = res.astype(o_ref.dtype)


# ----------------------------------------------------------------------------
# Glue (plain JAX): adaptive avg pool of the text embedding, parameter setup
# ----------------------------------------------------------------------------

def _adaptive_pool_matrix(n_in, n_out):
    """Matrix M (n_out, n_in) so that M @ x == adaptive_avg_pool1d(x, n_out)."""
    M = np.zeros((n_out, n_in), np.float32)
    for i in range(n_out):
        s = (i * n_in) // n_out
        e = -((-(i + 1) * n_in) // n_out)  # ceil((i+1)*n_in/n_out)
        M[i, s:e] = 1.0 / (e - s)
    return jnp.asarray(M)


def init_params(key, dim, num_heads, seq, hidden):
    ks = jax.random.split(key, 10)
    s = 0.05
    params = dict(
        temperature=jnp.ones((num_heads, 1, 1), jnp.float32),
        # mix_conv: Conv2d(dim + seq, dim, 1)
        mix_w=jax.random.normal(ks[0], (dim, dim + seq), jnp.float32) * s,
        mix_b=jax.random.normal(ks[1], (dim,), jnp.float32) * s,
        # qkv: Conv2d(dim, 3*dim, 1)
        qkv_w=jax.random.normal(ks[2], (3 * dim, dim), jnp.float32) * s,
        qkv_b=jax.random.normal(ks[3], (3 * dim,), jnp.float32) * s,
        # qkv_dwconv: Conv2d(3*dim, 3*dim, 3, padding=1, groups=3*dim)
        dw_w=jax.random.normal(ks[4], (3 * dim, 3, 3), jnp.float32) * s,
        dw_b=jax.random.normal(ks[5], (3 * dim,), jnp.float32) * s,
        # project_out: Conv2d(dim, dim, 1)
        proj_w=jax.random.normal(ks[6], (dim, dim), jnp.float32) * s,
        proj_b=jax.random.normal(ks[7], (dim,), jnp.float32) * s,
        # synthetic stand-in for the BERT last_hidden_state (1, seq, hidden)
        # TODO(synk): BERT tokenizer/model forward (BSP) is not translatable;
        # z is a deterministic synthetic tensor.
        z=jax.random.normal(ks[8], (1, seq, hidden), jnp.float32),
    )
    return params


def attention_forward(x, params, num_heads, roll_like_jnp=True):
    b, dim, h, w = x.shape
    hw = h * w
    c_head = dim // num_heads
    out_dtype = x.dtype
    f32 = jnp.float32
    bf16 = jnp.bfloat16

    # ---- batch-invariant text branch, folded in plain JAX (runs once) ------
    z = params["z"]                                    # (1, seq, hidden)
    M = _adaptive_pool_matrix(z.shape[2], h)           # (h, hidden)
    zp = jnp.einsum("oh,sh->so", M, z[0])              # (seq, h)

    mix_w = params["mix_w"]
    mix_wx, mix_wz = mix_w[:, :dim], mix_w[:, dim:]
    qkv_w, qkv_b = params["qkv_w"], params["qkv_b"]

    # fold mix_conv (+ residual) into the qkv 1x1 conv
    w_eff = qkv_w @ (mix_wx + jnp.eye(dim, dtype=f32))            # (3*dim, dim)
    text = (qkv_w @ mix_wz) @ zp                                  # (3*dim, h)
    eff_bias = (jnp.broadcast_to(text[:, :, None], (3 * dim, h, w))
                .reshape(3 * dim, hw)
                + (qkv_w @ params["mix_b"] + qkv_b)[:, None])     # (3*dim, hw)

    # per-head temperature as a per-channel column (channels are head-major)
    temp_chan = jnp.repeat(params["temperature"].reshape(num_heads, 1),
                           c_head, axis=0)                        # (dim, 1)

    # block-diagonal head mask, additive form (batch-invariant)
    hi = np.arange(dim) // c_head
    head_bias = jnp.asarray(
        np.where(hi[:, None] == hi[None, :], 0.0, -1e30).astype(np.float32))

    # depthwise-conv boundary masks for the 9 taps (batch-invariant)
    pos = np.arange(hw)
    prow, pcol = pos // w, pos % w
    masks = np.zeros((9, hw), np.float32)
    for di in (-1, 0, 1):
        for dj in (-1, 0, 1):
            k_idx = (di + 1) * 3 + (dj + 1)
            ok = ((prow + di >= 0) & (prow + di < h)
                  & (pcol + dj >= 0) & (pcol + dj < w))
            masks[k_idx] = ok.astype(np.float32)
    masks = jnp.asarray(masks)

    # bf16 MXU operands (f32 accumulation inside the kernel)
    x_flat = x.reshape(b, dim, hw).astype(bf16)
    w_eff_c = w_eff.astype(bf16)
    proj_w_c = params["proj_w"].astype(bf16)

    kernel = functools.partial(_fused_attention_kernel, W=w,
                               roll_like_jnp=roll_like_jnp)
    const2 = lambda i: (0, 0)

    flops_per_img = (2 * 3 * dim * dim * hw        # folded qkv 1x1 conv
                     + 9 * 2 * 3 * dim * hw        # depthwise 3x3
                     + 2 * dim * dim * hw          # q @ k^T
                     + 2 * dim * dim * hw          # p @ v
                     + 2 * dim * dim * hw)         # project_out
    cost = pl.CostEstimate(
        flops=int(b * flops_per_img),
        transcendentals=int(b * (dim * dim + 2 * dim)),
        bytes_accessed=int(b * dim * hw * (2 + 4)              # x in (bf16), out (f32)
                           + 3 * dim * dim * 2                 # W_eff
                           + 3 * dim * hw * 4                  # folded bias
                           + 3 * dim * 10 * 4                  # dw w + b
                           + dim * dim * 2 + dim * 4           # proj w + b
                           + dim * 4 + dim * dim * 4           # temp + head bias
                           + 9 * hw * 4))                      # tap masks

    out = pl.pallas_call(
        kernel,
        out_shape=jax.ShapeDtypeStruct((b, dim, hw), out_dtype),
        grid=(b,),
        in_specs=[
            pl.BlockSpec((1, dim, hw), lambda i: (i, 0, 0)),   # x (per image, bf16)
            pl.BlockSpec((3 * dim, dim), const2),              # W_eff (bf16, resident)
            pl.BlockSpec((3 * dim, hw), const2),               # folded per-pixel bias
            pl.BlockSpec((3 * dim, 9), const2),                # dwconv weights (3x3 flat)
            pl.BlockSpec((3 * dim, 1), const2),                # dwconv bias
            pl.BlockSpec((dim, dim), const2),                  # project_out w (bf16)
            pl.BlockSpec((dim, 1), const2),                    # project_out b
            pl.BlockSpec((dim, 1), const2),                    # per-channel temperature
            pl.BlockSpec((dim, dim), const2),                  # block-diag head bias
            pl.BlockSpec((9, hw), const2),                     # dwconv boundary masks
        ],
        out_specs=pl.BlockSpec((1, dim, hw), lambda i: (i, 0, 0)),
        compiler_params=pltpu.CompilerParams(
            dimension_semantics=("parallel",),
            vmem_limit_bytes=32 * 1024 * 1024,                 # safe on v5e/v6e/v7x
        ),
        cost_estimate=cost,
    )(x_flat, w_eff_c, eff_bias,
      params["dw_w"].reshape(3 * dim, 9), params["dw_b"].reshape(3 * dim, 1),
      proj_w_c, params["proj_b"].reshape(dim, 1),
      temp_chan, head_bias, masks)
    return out.reshape(b, dim, h, w)


if __name__ == "__main__":
    # small shapes consistent with the module (dim divisible by num_heads)
    B, DIM, H, W = 2, 8, 16, 16
    NUM_HEADS = 2
    SEQ, HIDDEN = 8, 32          # synthetic stand-in for BERT (seq_len, 768)

    key = jax.random.PRNGKey(0)
    kx, kp = jax.random.split(key)
    x = jax.random.normal(kx, (B, DIM, H, W), jnp.float32)
    params = init_params(kp, DIM, NUM_HEADS, SEQ, HIDDEN)

    roll_like_jnp = _roll_matches_jnp_roll()

    fwd = jax.jit(functools.partial(attention_forward, params=params,
                                    num_heads=NUM_HEADS,
                                    roll_like_jnp=roll_like_jnp))
    out = jax.block_until_ready(fwd(x))

    assert out.shape == (B, DIM, H, W)
    assert bool(jnp.all(jnp.isfinite(out)))
    print("KERNEL_OK")
</pallas_src>

<mosaic_0001>
module attributes {stable_mosaic.version = 11 : i64} {
  func.func @_roll_probe_kernel(%arg0: memref<8x128xf32, #tpu.memory_space<vmem>>, %arg1: memref<8x128xf32, #tpu.memory_space<vmem>>) attributes {dimension_semantics = [], scalar_prefetch = 0 : i64, scratch_operands = 0 : i64, tpu.core_type = #tpu.core_type<tc>} {
    %c0 = arith.constant 0 : index
    %c0_0 = arith.constant 0 : index
    %0 = vector.load %arg0[%c0, %c0_0] : memref<8x128xf32, #tpu.memory_space<vmem>>, vector<8x128xf32>
    %c1_i32 = arith.constant 1 : i32
    %1 = tpu.dynamic_rotate %0 by %c1_i32 dim 1 : vector<8x128xf32>, i32 -> vector<8x128xf32>
    %c0_1 = arith.constant 0 : index
    %c0_2 = arith.constant 0 : index
    %2 = vector.load %arg1[%c0_1, %c0_2] : memref<8x128xf32, #tpu.memory_space<vmem>>, vector<8x128xf32>
    tpu.vector_store %arg1[%c0_1, %c0_2], %1 {strides = array<i32>} : memref<8x128xf32, #tpu.memory_space<vmem>>, vector<8x128xf32>,
    return
  }
}

</mosaic_0001>

<bundles_post_ra>
// kernel: tpu_custom_call.1
= control target key start
LH: loop header
LB: loop body
LE: loop exit
PB: predicated region body
PF: predicated region fallthrough
CT: control target
= control target key end

     0   :  { %6 = vsyncpa [#allocation3], 0  ;;  %s106_s0 = inlined_call_operand.hbm [shape: f32[8,128], index: 0, kind: input, shape index: {}]   ;;  %s107_s1 = inlined_call_operand.hbm [shape: f32[8,128], index: 1, kind: output, shape index: {}]  }
   0x1   :  { %7 = vsyncpa [#allocation4], 0  ;;  %s87_s6 = smov [#allocation2]  }
   0x2   :  { %s14_s7 = sshll.u32 %s87_s6, 4  ;;  %s15_s7 = int_to_ptr.vmem [resolvable:$true] %s14_s7 }
   0x3   :  { %s51_s8 = scalar_lea.vmem %s15_s7, 128  ;;  %p56_p1 = scmp.lt.s32.totalorder %s15_s7, %s15_s7 }
   0x4   :  { %p52_p0 = scmp.ne.s32.totalorder %s15_s7, %s51_s8  ;;  %p57_p2 = scmp.lt.s32.totalorder %s51_s8, %s51_s8 }
   0x6   :  { %p58_p3 = por %p57_p2, %p56_p1 }
   0x8   :  { %p59_p4 = pnand %p58_p3, %p52_p0 }
   0xa   :  { %62 = shalt.err (!%p59_p4)
}
   0xb   :  { %17 = dma.hbm_to_vmem [thread:$0]  %s106_s0, 128, %s15_s7, [#allocation3]  }
   0xc   :  { %83 = dma.done.wait [#allocation3], 128  }
   0xd   :  { %84 = vsyncadd [#allocation3], 4294967168  ;;  %v21_v0 = vld [vmem:[#allocation2] sm:$0xff]  ;;  %s88_s11 = smov 1   ;;  %s89_s12 = smov [#allocation5]  }
   0xe   :  { %22 = vrot.lane.b32.xlu0 %v21_v0, %s88_s11  ;;  %s31_s13 = sshll.u32 %s89_s12, 4  ;;  %s32_s13 = int_to_ptr.vmem [resolvable:$true] %s31_s13 }
   0xf   :  { %s63_s14 = scalar_lea.vmem %s32_s13, 128  ;;  %p68_p6 = scmp.lt.s32.totalorder %s32_s13, %s32_s13 }
  0x10   :  { %p64_p5 = scmp.ne.s32.totalorder %s32_s13, %s63_s14  ;;  %p69_p7 = scmp.lt.s32.totalorder %s63_s14, %s63_s14 }
  0x12   :  { %p70_p8 = por %p69_p7, %p68_p6 }
  0x14   :  { %p71_p9 = pnand %p70_p8, %p64_p5 }
  0x80   :  { %v23_v1 = vpop.permute.xlu0 %22 }
  0x81   :  { %24 = vst [vmem:[#allocation5] sm:$0xff] %v23_v1 }
  0x82   :  { %74 = shalt.err (!%p71_p9)
}
  0x83   :  { %34 = dma.vmem_to_hbm [thread:$0]  %s32_s13, 128, %s107_s1, [#allocation4]  }
  0x84   :  { %85 = dma.done.wait [#allocation4], 128  }
  0x85   :  { %86 = vsyncadd [#allocation4], 4294967168 }
  0x86   :  { %38 = vsyncpa [#allocation3], 1 }
  0x87   :  { %39 = vsyncpa [#allocation4], 1 }

</bundles_post_ra>
